<compile_context>
chip_gen: v7x
topology: tpu7x:2x2x1
jax: 0.10.0
libtpu: 0.0.40
codegen_flags: <defaults>
</compile_context>

<pallas_src>
import jax
import jax.numpy as jnp
import numpy as np
from jax import lax
from jax.experimental import pallas as pl
from jax.experimental.pallas import tpu as pltpu

PRE_NMS_THRESH = 0.05
PRE_NMS_TOP_N = 1000

# Safe on every generation (v5e/v6e: 128 MiB phys, v7x: 64 MiB phys); blocks at
# TILE<=2048 are ~3 MiB double-buffered so this leaves large headroom.
_VMEM_LIMIT = 32 * 1024 * 1024


def _pick_tile(n, max_tile):
    """Largest multiple of 128 that divides n and is <= max_tile; else full n."""
    if n % 128 != 0:
        return n
    best = 128
    t = 128
    cap = min(n, max_tile)
    while t <= cap:
        if n % t == 0:
            best = t
        t += 128
    return best


# ---------------------------------------------------------------------------
# Kernel 1: dense per-level post-processing, grid = (image, HW tile)
# ---------------------------------------------------------------------------
def _level_kernel(img_wh_ref,       # SMEM (N, 2) int32, (w, h) per image
                  loc_ref,          # VMEM (2, T)      locations, row0=x row1=y
                  cls_ref,          # VMEM (1, C, T)   cls logits
                  reg_ref,          # VMEM (1, 4, T)   box regression (l,t,r,b)
                  ctr_ref,          # VMEM (1, 1, T)   centerness logit
                  scores_ref,       # VMEM (1, C, T)   sqrt(sig(cls)*sig(ctr))
                  cand_ref,         # VMEM (1, C, T)   int8 candidate mask
                  boxes_ref,        # VMEM (1, 4, T)   decoded+clipped xyxy rows
                  cnt_ref):         # VMEM (1, 1, 8, 128) int32 per-tile count
    i = pl.program_id(0)

    cls_sig = jax.nn.sigmoid(cls_ref[0].astype(jnp.float32))     # (C, T)
    ctr_sig = jax.nn.sigmoid(ctr_ref[0].astype(jnp.float32))     # (1, T)

    # candidate_inds = box_cls > pre_nms_thresh (before centerness weighting)
    cand = cls_sig > PRE_NMS_THRESH
    cand_ref[0] = cand.astype(jnp.int8)                          # 4x smaller stream

    # per-tile partial candidate count; summed + clamped in glue.
    count = jnp.sum(cand.astype(jnp.int32))
    cnt_ref[...] = jnp.full((1, 1, 8, 128), count, dtype=jnp.int32)

    # 'scores' field = sqrt(box_cls * centerness)
    scores_ref[0] = jnp.sqrt(cls_sig * ctr_sig)

    # detections rows: x1 = x - l, y1 = y - t, x2 = x + r, y2 = y + b,
    # clipped to [0, w-1] / [0, h-1]  (clip_to_image, TO_REMOVE = 1).
    loc_x = loc_ref[0:1, :].astype(jnp.float32)                  # (1, T)
    loc_y = loc_ref[1:2, :].astype(jnp.float32)
    reg = reg_ref[0].astype(jnp.float32)                         # (4, T)
    w = img_wh_ref[i, 0].astype(jnp.float32) - 1.0
    h = img_wh_ref[i, 1].astype(jnp.float32) - 1.0
    boxes_ref[0, 0:1, :] = jnp.clip(loc_x - reg[0:1, :], 0.0, w)
    boxes_ref[0, 1:2, :] = jnp.clip(loc_y - reg[1:2, :], 0.0, h)
    boxes_ref[0, 2:3, :] = jnp.clip(loc_x + reg[2:3, :], 0.0, w)
    boxes_ref[0, 3:4, :] = jnp.clip(loc_y + reg[3:4, :], 0.0, h)


def postprocess_level(locations, box_cls, box_regression, centerness, img_wh,
                      *, max_tile_hw=2048):
    """Dense part of forward_for_single_feature_map, channel-major layout.

    locations: (HW, 2) float (x, y); box_cls: (N, C, H, W);
    box_regression: (N, 4, H, W); centerness: (N, 1, H, W);
    img_wh: (N, 2) int32 (w, h).
    Returns scores (N, C, HW) f32, cand (N, C, HW) int8, boxes (N, 4, HW)
    xyxy rows, topn (N,) clamped candidate counts.
    """
    N, C, H, W = box_cls.shape
    HW = H * W
    T = _pick_tile(HW, max_tile_hw)
    n_t = HW // T

    # NCHW -> (N, C, HW) is a free reshape (no transpose); HW stays in lanes.
    cls = box_cls.reshape(N, C, HW)
    reg = box_regression.reshape(N, 4, HW)
    ctr = centerness.reshape(N, 1, HW)
    loc = jnp.transpose(locations.astype(jnp.float32))            # (2, HW), tiny

    grid_spec = pltpu.PrefetchScalarGridSpec(
        num_scalar_prefetch=1,
        grid=(N, n_t),
        in_specs=[
            pl.BlockSpec((2, T), lambda i, t, *_: (0, t)),
            pl.BlockSpec((1, C, T), lambda i, t, *_: (i, 0, t)),
            pl.BlockSpec((1, 4, T), lambda i, t, *_: (i, 0, t)),
            pl.BlockSpec((1, 1, T), lambda i, t, *_: (i, 0, t)),
        ],
        out_specs=[
            pl.BlockSpec((1, C, T), lambda i, t, *_: (i, 0, t)),
            pl.BlockSpec((1, C, T), lambda i, t, *_: (i, 0, t)),
            pl.BlockSpec((1, 4, T), lambda i, t, *_: (i, 0, t)),
            pl.BlockSpec((1, 1, 8, 128), lambda i, t, *_: (i, t, 0, 0)),
        ],
    )
    out_shape = (
        jax.ShapeDtypeStruct((N, C, HW), jnp.float32),
        jax.ShapeDtypeStruct((N, C, HW), jnp.int8),
        jax.ShapeDtypeStruct((N, 4, HW), jnp.float32),
        jax.ShapeDtypeStruct((N, n_t, 8, 128), jnp.int32),
    )
    scores, cand, boxes, cnt = pl.pallas_call(
        _level_kernel,
        grid_spec=grid_spec,
        out_shape=out_shape,
        compiler_params=pltpu.CompilerParams(
            dimension_semantics=("parallel", "parallel"),
            vmem_limit_bytes=_VMEM_LIMIT),
    )(img_wh, loc, cls, reg, ctr)

    # pre_nms_top_n = candidate_inds.view(N,-1).sum(1).clamp(max=pre_nms_top_n)
    # (clamp applied AFTER the full per-image sum of per-tile partials).
    topn = jnp.minimum(jnp.sum(cnt[:, :, 0, 0], axis=1), PRE_NMS_TOP_N)
    return scores, cand, boxes, topn


# ---------------------------------------------------------------------------
# Kernel 2: fused, batched mask-coefficient matmuls, grid = (image, P tile)
# ---------------------------------------------------------------------------
def _mask_coef_kernel(cofs_ref, mask_ref, out_ref):
    # cofs_ref: (1, 4K, 32) bf16; mask_ref: (1, 32, TP) bf16; out_ref: (1, 4K, TP) f32
    out = jnp.dot(cofs_ref[0], mask_ref[0], preferred_element_type=jnp.float32)
    out_ref[0] = jax.nn.sigmoid(out)


def mask_heads(feat_masks, det_cofs, *, max_tile_p=2048):
    """Fused + batched mask-head matmuls of select_over_all_levels.

    feat_masks: (N, 32, Hm, Wm); det_cofs: (N, K, 128) selected coefficients.
    Returns (N, 4, K, Hm*Wm) f32 with [n, j, k, p] =
      sigmoid(feat_masks[n, :, p] . det_cofs[n, k, 32*j:32*(j+1)])
    i.e. the stacked [pos_masks00, 01, 10, 11] pre-crop masks, P lane-dense.
    """
    N = feat_masks.shape[0]
    P = feat_masks.shape[2] * feat_masks.shape[3]
    K = det_cofs.shape[1]
    K4 = 4 * K
    TP = _pick_tile(P, max_tile_p)
    n_p = P // TP

    # (N,K,4,32) -> (N,4,K,32) -> (N,4K,32): row j*K+k = det_cofs[k, 32j:32(j+1)]
    cofs_q = det_cofs.reshape(N, K, 4, 32).transpose(0, 2, 1, 3).reshape(N, K4, 32)
    cofs_bf = cofs_q.astype(jnp.bfloat16)
    feat_bf = feat_masks.reshape(N, 32, P).astype(jnp.bfloat16)

    out = pl.pallas_call(
        _mask_coef_kernel,
        grid=(N, n_p),
        in_specs=[
            pl.BlockSpec((1, K4, 32), lambda n, p: (n, 0, 0)),
            pl.BlockSpec((1, 32, TP), lambda n, p: (n, 0, p)),
        ],
        out_specs=pl.BlockSpec((1, K4, TP), lambda n, p: (n, 0, p)),
        out_shape=jax.ShapeDtypeStruct((N, K4, P), jnp.float32),
        compiler_params=pltpu.CompilerParams(
            dimension_semantics=("parallel", "parallel"),
            vmem_limit_bytes=_VMEM_LIMIT),
    )(cofs_bf, feat_bf)
    return out.reshape(N, 4, K, P)


if __name__ == "__main__":
    key = jax.random.PRNGKey(0)
    N, C, H, W = 2, 4, 16, 16        # batch, num_classes-1, spatial (one FPN level)
    Hm = Wm = 16                     # mask feature-map size
    stride = 8
    K_dets = 8                       # fixed number of detections fed to mask kernel
    HW = H * W
    P = Hm * Wm

    k1, k2, k3, k4, k5 = jax.random.split(key, 5)
    box_cls = jax.random.normal(k1, (N, C, H, W), jnp.float32)
    box_regression = jax.random.uniform(k2, (N, 4, H, W), jnp.float32, 0.0, 20.0)
    centerness = jax.random.normal(k3, (N, 1, H, W), jnp.float32)
    det_cofs = jax.random.normal(k4, (N, 32 * 4, H, W), jnp.float32)
    feat_masks = jax.random.normal(k5, (N, 32, Hm, Wm), jnp.float32)

    # FCOS-style locations for this level, (x, y) order.
    xs = (jnp.arange(W, dtype=jnp.float32) + 0.5) * stride
    ys = (jnp.arange(H, dtype=jnp.float32) + 0.5) * stride
    yy, xx = jnp.meshgrid(ys, xs, indexing="ij")
    locations = jnp.stack([xx.reshape(-1), yy.reshape(-1)], axis=-1)  # (HW, 2)

    img_h, img_w = 128, 128
    img_wh = jnp.array([[img_w, img_h]] * N, dtype=jnp.int32)

    # max_tile_hw=128 so the HW-tiled path (2 tiles) is exercised at demo size.
    scores, cand, boxes, topn = postprocess_level(
        locations, box_cls, box_regression, centerness, img_wh, max_tile_hw=128)
    jax.block_until_ready((scores, cand, boxes, topn))

    # ---- pure-JAX reference checks of the dense hot path (channel-major) ----
    cls_r = jax.nn.sigmoid(box_cls.reshape(N, C, HW))
    ctr_r = jax.nn.sigmoid(centerness.reshape(N, 1, HW))
    np.testing.assert_allclose(np.asarray(scores),
                               np.asarray(jnp.sqrt(cls_r * ctr_r)),
                               rtol=1e-5, atol=1e-5)
    cand_r = cls_r > PRE_NMS_THRESH
    np.testing.assert_array_equal(np.asarray(cand),
                                  np.asarray(cand_r).astype(np.int8))
    topn_r = jnp.minimum(jnp.sum(cand_r.reshape(N, -1), axis=1), PRE_NMS_TOP_N)
    np.testing.assert_array_equal(np.asarray(topn), np.asarray(topn_r))

    reg_r = box_regression.reshape(N, 4, HW)
    loc_t = jnp.transpose(locations)                            # (2, HW)
    boxes_r = jnp.stack([
        jnp.clip(loc_t[0] - reg_r[:, 0], 0.0, img_w - 1.0),
        jnp.clip(loc_t[1] - reg_r[:, 1], 0.0, img_h - 1.0),
        jnp.clip(loc_t[0] + reg_r[:, 2], 0.0, img_w - 1.0),
        jnp.clip(loc_t[1] + reg_r[:, 3], 0.0, img_h - 1.0)], axis=1)
    np.testing.assert_allclose(np.asarray(boxes), np.asarray(boxes_r),
                               rtol=1e-5, atol=1e-5)

    # TODO(synk): boolean nonzero gather, per-image dynamic top-k, boxlist_ml_nms,
    # kthvalue score thresholding, CropSplit (crop_cuda) and bilinear
    # F.interpolate are data-dependent / host-side ops with no clean Pallas
    # equivalent; a fixed-K lax.top_k in plain-JAX glue stands in for NMS so the
    # fused, batched mask-coefficient kernel can be exercised.
    cofs_flat = det_cofs.reshape(N, 128, HW)                    # channel-major
    best_per_loc = jnp.max(scores, axis=1)                      # (N, HW)
    _, top_idx = lax.top_k(best_per_loc, K_dets)                # (N, K)
    per_cofs = jnp.take_along_axis(cofs_flat, top_idx[:, None, :], axis=2)  # (N,128,K)
    per_cofs = jnp.transpose(per_cofs, (0, 2, 1))               # (N, K, 128)

    pos_masks = mask_heads(feat_masks, per_cofs, max_tile_p=128)  # (N, 4, K, P)
    jax.block_until_ready(pos_masks)

    # reference check for the fused bf16 mask matmul kernel (all 4 quadrants)
    c_ref = np.asarray(per_cofs.astype(jnp.bfloat16).astype(jnp.float32),
                       dtype=np.float64).reshape(N, K_dets, 4, 32).transpose(0, 2, 1, 3)
    m_ref = np.asarray(feat_masks.reshape(N, 32, P).astype(jnp.bfloat16)
                       .astype(jnp.float32), dtype=np.float64)
    logits = np.einsum("njkc,ncp->njkp", c_ref, m_ref)
    ref = 1.0 / (1.0 + np.exp(-logits))
    np.testing.assert_allclose(np.asarray(pos_masks), ref, rtol=5e-3, atol=5e-3)

    print("KERNEL_OK")
</pallas_src>

<mosaic_0001>
module attributes {stable_mosaic.version = 11 : i64} {
  func.func @_level_kernel(%arg0: i32, %arg1: i32, %arg2: memref<2x2xi32, #tpu.memory_space<smem>>, %arg3: memref<2x128xf32, #tpu.memory_space<vmem>>, %arg4: memref<1x4x128xf32, #tpu.memory_space<vmem>>, %arg5: memref<1x4x128xf32, #tpu.memory_space<vmem>>, %arg6: memref<1x1x128xf32, #tpu.memory_space<vmem>>, %arg7: memref<1x4x128xf32, #tpu.memory_space<vmem>>, %arg8: memref<1x4x128xi8, #tpu.memory_space<vmem>>, %arg9: memref<1x4x128xf32, #tpu.memory_space<vmem>>, %arg10: memref<1x1x8x128xi32, #tpu.memory_space<vmem>>) attributes {dimension_semantics = [#tpu.dimension_semantics<parallel>, #tpu.dimension_semantics<parallel>], iteration_bounds = array<i64: 2, 2>, scalar_prefetch = 1 : i64, scratch_operands = 0 : i64, tpu.core_type = #tpu.core_type<tc>, window_params = [{transform_indices = @transform_0, window_bounds = array<i64: 2, 128>}, {transform_indices = @transform_1, window_bounds = array<i64: 1, 4, 128>}, {transform_indices = @transform_2, window_bounds = array<i64: 1, 4, 128>}, {transform_indices = @transform_3, window_bounds = array<i64: 1, 1, 128>}, {transform_indices = @transform_4, window_bounds = array<i64: 1, 4, 128>}, {transform_indices = @transform_5, window_bounds = array<i64: 1, 4, 128>}, {transform_indices = @transform_6, window_bounds = array<i64: 1, 4, 128>}, {transform_indices = @transform_7, window_bounds = array<i64: 1, 1, 8, 128>}]} {
    %c0 = arith.constant 0 : index
    %c0_0 = arith.constant 0 : index
    %c0_1 = arith.constant 0 : index
    %0 = vector.load %arg4[%c0, %c0_0, %c0_1] : memref<1x4x128xf32, #tpu.memory_space<vmem>>, vector<1x4x128xf32>
    %1 = vector.shape_cast %0 : vector<1x4x128xf32> to vector<4x128xf32>
    %2 = arith.negf %1 : vector<4x128xf32>
    %3 = math.exp %2 : vector<4x128xf32>
    %cst = arith.constant 1.000000e+00 : f32
    %4 = vector.broadcast %cst : f32 to vector<4x128xf32>
    %5 = arith.addf %4, %3 : vector<4x128xf32>
    %6 = arith.divf %4, %5 : vector<4x128xf32>
    %c0_2 = arith.constant 0 : index
    %c0_3 = arith.constant 0 : index
    %c0_4 = arith.constant 0 : index
    %7 = vector.load %arg6[%c0_2, %c0_3, %c0_4] : memref<1x1x128xf32, #tpu.memory_space<vmem>>, vector<1x1x128xf32>
    %8 = vector.shape_cast %7 : vector<1x1x128xf32> to vector<1x128xf32>
    %9 = arith.negf %8 : vector<1x128xf32>
    %10 = math.exp %9 : vector<1x128xf32>
    %cst_5 = arith.constant 1.000000e+00 : f32
    %11 = vector.broadcast %cst_5 : f32 to vector<1x128xf32>
    %12 = arith.addf %11, %10 : vector<1x128xf32>
    %13 = arith.divf %11, %12 : vector<1x128xf32>
    %cst_6 = arith.constant 5.000000e-02 : f32
    %14 = vector.broadcast %cst_6 : f32 to vector<4x128xf32>
    %15 = arith.cmpf ogt, %6, %14 : vector<4x128xf32>
    %16 = arith.extui %15 : vector<4x128xi1> to vector<4x128xi8>
    %c0_7 = arith.constant 0 : index
    %c0_8 = arith.constant 0 : index
    %c0_9 = arith.constant 0 : index
    %17 = vector.load %arg8[%c0_7, %c0_8, %c0_9] : memref<1x4x128xi8, #tpu.memory_space<vmem>>, vector<1x4x128xi8>
    %18 = vector.shape_cast %17 : vector<1x4x128xi8> to vector<4x128xi8>
    %19 = vector.shape_cast %16 : vector<4x128xi8> to vector<1x4x128xi8>
    tpu.vector_store %arg8[%c0_7, %c0_8, %c0_9], %19 {strides = array<i32>} : memref<1x4x128xi8, #tpu.memory_space<vmem>>, vector<1x4x128xi8>,
    %20 = arith.extui %15 : vector<4x128xi1> to vector<4x128xi32>
    %21 = vector.shape_cast %20 : vector<4x128xi32> to vector<1x4x128xi32>
    %cst_10 = arith.constant dense<0> : vector<1xi32>
    %22 = vector.multi_reduction <add>, %21, %cst_10 [1, 2] : vector<1x4x128xi32> to vector<1xi32>
    %23 = vector.shape_cast %22 : vector<1xi32> to vector<1x1x1xi32>
    %24 = vector.extract %23[0, 0, 0] : i32 from vector<1x1x1xi32>
    %25 = vector.broadcast %24 : i32 to vector<1x1x8x128xi32>
    %c0_11 = arith.constant 0 : index
    %c0_12 = arith.constant 0 : index
    %c0_13 = arith.constant 0 : index
    %c0_14 = arith.constant 0 : index
    %26 = vector.load %arg10[%c0_11, %c0_12, %c0_13, %c0_14] : memref<1x1x8x128xi32, #tpu.memory_space<vmem>>, vector<1x1x8x128xi32>
    tpu.vector_store %arg10[%c0_11, %c0_12, %c0_13, %c0_14], %25 {strides = array<i32>} : memref<1x1x8x128xi32, #tpu.memory_space<vmem>>, vector<1x1x8x128xi32>,
    %27 = vector.broadcast %13 : vector<1x128xf32> to vector<4x128xf32>
    %28 = arith.mulf %6, %27 : vector<4x128xf32>
    %29 = math.sqrt %28 : vector<4x128xf32>
    %c0_15 = arith.constant 0 : index
    %c0_16 = arith.constant 0 : index
    %c0_17 = arith.constant 0 : index
    %30 = vector.load %arg7[%c0_15, %c0_16, %c0_17] : memref<1x4x128xf32, #tpu.memory_space<vmem>>, vector<1x4x128xf32>
    %31 = vector.shape_cast %30 : vector<1x4x128xf32> to vector<4x128xf32>
    %32 = vector.shape_cast %29 : vector<4x128xf32> to vector<1x4x128xf32>
    tpu.vector_store %arg7[%c0_15, %c0_16, %c0_17], %32 {strides = array<i32>} : memref<1x4x128xf32, #tpu.memory_space<vmem>>, vector<1x4x128xf32>,
    %c0_18 = arith.constant 0 : index
    %c0_19 = arith.constant 0 : index
    %33 = vector.load %arg3[%c0_18, %c0_19] : memref<2x128xf32, #tpu.memory_space<vmem>>, vector<1x128xf32>
    %c1 = arith.constant 1 : index
    %c0_20 = arith.constant 0 : index
    %34 = vector.load %arg3[%c1, %c0_20] : memref<2x128xf32, #tpu.memory_space<vmem>>, vector<1x128xf32>
    %c0_21 = arith.constant 0 : index
    %c0_22 = arith.constant 0 : index
    %c0_23 = arith.constant 0 : index
    %35 = vector.load %arg5[%c0_21, %c0_22, %c0_23] : memref<1x4x128xf32, #tpu.memory_space<vmem>>, vector<1x4x128xf32>
    %36 = vector.shape_cast %35 : vector<1x4x128xf32> to vector<4x128xf32>
    %37 = arith.index_cast %arg0 : i32 to index
    %c0_24 = arith.constant 0 : index
    %38 = memref.load %arg2[%37, %c0_24] : memref<2x2xi32, #tpu.memory_space<smem>>
    %39 = arith.sitofp %38 : i32 to f32
    %cst_25 = arith.constant 1.000000e+00 : f32
    %40 = arith.subf %39, %cst_25 : f32
    %41 = arith.index_cast %arg0 : i32 to index
    %c1_26 = arith.constant 1 : index
    %42 = memref.load %arg2[%41, %c1_26] : memref<2x2xi32, #tpu.memory_space<smem>>
    %43 = arith.sitofp %42 : i32 to f32
    %cst_27 = arith.constant 1.000000e+00 : f32
    %44 = arith.subf %43, %cst_27 : f32
    %45 = vector.extract_strided_slice %36 {offsets = [0, 0], sizes = [1, 128], strides = [1, 1]} : vector<4x128xf32> to vector<1x128xf32>
    %46 = arith.subf %33, %45 : vector<1x128xf32>
    %cst_28 = arith.constant 0.000000e+00 : f32
    %47 = vector.broadcast %cst_28 : f32 to vector<1x128xf32>
    %48 = arith.maximumf %47, %46 : vector<1x128xf32>
    %49 = vector.broadcast %40 : f32 to vector<1x128xf32>
    %50 = arith.minimumf %49, %48 : vector<1x128xf32>
    %c0_29 = arith.constant 0 : index
    %c0_30 = arith.constant 0 : index
    %c0_31 = arith.constant 0 : index
    %51 = vector.load %arg9[%c0_29, %c0_30, %c0_31] : memref<1x4x128xf32, #tpu.memory_space<vmem>>, vector<1x1x128xf32>
    %52 = vector.shape_cast %51 : vector<1x1x128xf32> to vector<1x128xf32>
    %53 = vector.shape_cast %50 : vector<1x128xf32> to vector<1x1x128xf32>
    tpu.vector_store %arg9[%c0_29, %c0_30, %c0_31], %53 {strides = array<i32>} : memref<1x4x128xf32, #tpu.memory_space<vmem>>, vector<1x1x128xf32>,
    %54 = vector.extract_strided_slice %36 {offsets = [1, 0], sizes = [1, 128], strides = [1, 1]} : vector<4x128xf32> to vector<1x128xf32>
    %55 = arith.subf %34, %54 : vector<1x128xf32>
    %cst_32 = arith.constant 0.000000e+00 : f32
    %56 = vector.broadcast %cst_32 : f32 to vector<1x128xf32>
    %57 = arith.maximumf %56, %55 : vector<1x128xf32>
    %58 = vector.broadcast %44 : f32 to vector<1x128xf32>
    %59 = arith.minimumf %58, %57 : vector<1x128xf32>
    %c0_33 = arith.constant 0 : index
    %c1_34 = arith.constant 1 : index
    %c0_35 = arith.constant 0 : index
    %60 = vector.load %arg9[%c0_33, %c1_34, %c0_35] : memref<1x4x128xf32, #tpu.memory_space<vmem>>, vector<1x1x128xf32>
    %61 = vector.shape_cast %60 : vector<1x1x128xf32> to vector<1x128xf32>
    %62 = vector.shape_cast %59 : vector<1x128xf32> to vector<1x1x128xf32>
    tpu.vector_store %arg9[%c0_33, %c1_34, %c0_35], %62 {strides = array<i32>} : memref<1x4x128xf32, #tpu.memory_space<vmem>>, vector<1x1x128xf32>,
    %63 = vector.extract_strided_slice %36 {offsets = [2, 0], sizes = [1, 128], strides = [1, 1]} : vector<4x128xf32> to vector<1x128xf32>
    %64 = arith.addf %33, %63 : vector<1x128xf32>
    %cst_36 = arith.constant 0.000000e+00 : f32
    %65 = vector.broadcast %cst_36 : f32 to vector<1x128xf32>
    %66 = arith.maximumf %65, %64 : vector<1x128xf32>
    %67 = vector.broadcast %40 : f32 to vector<1x128xf32>
    %68 = arith.minimumf %67, %66 : vector<1x128xf32>
    %c0_37 = arith.constant 0 : index
    %c2 = arith.constant 2 : index
    %c0_38 = arith.constant 0 : index
    %69 = vector.load %arg9[%c0_37, %c2, %c0_38] : memref<1x4x128xf32, #tpu.memory_space<vmem>>, vector<1x1x128xf32>
    %70 = vector.shape_cast %69 : vector<1x1x128xf32> to vector<1x128xf32>
    %71 = vector.shape_cast %68 : vector<1x128xf32> to vector<1x1x128xf32>
    tpu.vector_store %arg9[%c0_37, %c2, %c0_38], %71 {strides = array<i32>} : memref<1x4x128xf32, #tpu.memory_space<vmem>>, vector<1x1x128xf32>,
    %72 = vector.extract_strided_slice %36 {offsets = [3, 0], sizes = [1, 128], strides = [1, 1]} : vector<4x128xf32> to vector<1x128xf32>
    %73 = arith.addf %34, %72 : vector<1x128xf32>
    %cst_39 = arith.constant 0.000000e+00 : f32
    %74 = vector.broadcast %cst_39 : f32 to vector<1x128xf32>
    %75 = arith.maximumf %74, %73 : vector<1x128xf32>
    %76 = vector.broadcast %44 : f32 to vector<1x128xf32>
    %77 = arith.minimumf %76, %75 : vector<1x128xf32>
    %c0_40 = arith.constant 0 : index
    %c3 = arith.constant 3 : index
    %c0_41 = arith.constant 0 : index
    %78 = vector.load %arg9[%c0_40, %c3, %c0_41] : memref<1x4x128xf32, #tpu.memory_space<vmem>>, vector<1x1x128xf32>
    %79 = vector.shape_cast %78 : vector<1x1x128xf32> to vector<1x128xf32>
    %80 = vector.shape_cast %77 : vector<1x128xf32> to vector<1x1x128xf32>
    tpu.vector_store %arg9[%c0_40, %c3, %c0_41], %80 {strides = array<i32>} : memref<1x4x128xf32, #tpu.memory_space<vmem>>, vector<1x1x128xf32>,
    return
  }
  func.func @transform_0(%arg0: i32, %arg1: i32, %arg2: memref<2x2xi32, #tpu.memory_space<smem>>) -> (i32, i32) {
    %c0_i32 = arith.constant 0 : i32
    %c0_i32_0 = arith.constant 0 : i32
    return %c0_i32, %arg1 : i32, i32
  }
  func.func @transform_1(%arg0: i32, %arg1: i32, %arg2: memref<2x2xi32, #tpu.memory_space<smem>>) -> (i32, i32, i32) {
    %c0_i32 = arith.constant 0 : i32
    %c0_i32_0 = arith.constant 0 : i32
    return %arg0, %c0_i32, %arg1 : i32, i32, i32
  }
  func.func @transform_2(%arg0: i32, %arg1: i32, %arg2: memref<2x2xi32, #tpu.memory_space<smem>>) -> (i32, i32, i32) {
    %c0_i32 = arith.constant 0 : i32
    %c0_i32_0 = arith.constant 0 : i32
    return %arg0, %c0_i32, %arg1 : i32, i32, i32
  }
  func.func @transform_3(%arg0: i32, %arg1: i32, %arg2: memref<2x2xi32, #tpu.memory_space<smem>>) -> (i32, i32, i32) {
    %c0_i32 = arith.constant 0 : i32
    %c0_i32_0 = arith.constant 0 : i32
    return %arg0, %c0_i32, %arg1 : i32, i32, i32
  }
  func.func @transform_4(%arg0: i32, %arg1: i32, %arg2: memref<2x2xi32, #tpu.memory_space<smem>>) -> (i32, i32, i32) {
    %c0_i32 = arith.constant 0 : i32
    %c0_i32_0 = arith.constant 0 : i32
    return %arg0, %c0_i32, %arg1 : i32, i32, i32
  }
  func.func @transform_5(%arg0: i32, %arg1: i32, %arg2: memref<2x2xi32, #tpu.memory_space<smem>>) -> (i32, i32, i32) {
    %c0_i32 = arith.constant 0 : i32
    %c0_i32_0 = arith.constant 0 : i32
    return %arg0, %c0_i32, %arg1 : i32, i32, i32
  }
  func.func @transform_6(%arg0: i32, %arg1: i32, %arg2: memref<2x2xi32, #tpu.memory_space<smem>>) -> (i32, i32, i32) {
    %c0_i32 = arith.constant 0 : i32
    %c0_i32_0 = arith.constant 0 : i32
    return %arg0, %c0_i32, %arg1 : i32, i32, i32
  }
  func.func @transform_7(%arg0: i32, %arg1: i32, %arg2: memref<2x2xi32, #tpu.memory_space<smem>>) -> (i32, i32, i32, i32) {
    %c0_i32 = arith.constant 0 : i32
    %c0_i32_0 = arith.constant 0 : i32
    %c0_i32_1 = arith.constant 0 : i32
    return %arg0, %arg1, %c0_i32, %c0_i32_0 : i32, i32, i32, i32
  }
}

</mosaic_0001>

<bundles_post_ra>
// kernel: tpu_custom_call.1
= control target key start
LH: loop header
LB: loop body
LE: loop exit
PB: predicated region body
PF: predicated region fallthrough
CT: control target
= control target key end

     0   :  { %s1889_s0 = inlined_call_operand.hbm [shape: s32[2,2], index: 0, kind: input, shape index: {}]   ;;  %s1890_s1 = inlined_call_operand.hbm [shape: f32[2,256], index: 1, kind: input, shape index: {}]   ;;  %s1891_s2 = inlined_call_operand.hbm [shape: f32[2,4,256], index: 2, kind: input, shape index: {}]   ;;  %s1892_s3 = inlined_call_operand.hbm [shape: f32[2,4,256], index: 3, kind: input, shape index: {}]   ;;  %s1893_s4 = inlined_call_operand.vmem [shape: f32[2,1,256], index: 4, kind: input, shape index: {}]   ;;  %s1894_s5 = inlined_call_operand.hbm [shape: f32[2,4,256], index: 5, kind: output, shape index: {0}]   ;;  %s1895_s6 = inlined_call_operand.hbm [shape: s8[2,4,256], index: 6, kind: output, shape index: {1}]   ;;  %s1896_s7 = inlined_call_operand.hbm [shape: f32[2,4,256], index: 7, kind: output, shape index: {2}]   ;;  %s1897_s8 = inlined_call_operand.hbm [shape: s32[2,2,8,128], index: 8, kind: output, shape index: {3}]  }
   0x1   :  { %1918 = sst [smem:[#allocation30_spill]] %s1891_s2  ;;  %s1043_s29 = scalar_lea.hbm %s1889_s0, 32 }
   0x2   :  { %1919 = sst [smem:[#allocation31_spill]] %s1893_s4  ;;  %p1044_p0 = scmp.ne.s32.totalorder %s1889_s0, %s1043_s29 }
   0x3   :  { %1920 = sst [smem:[#allocation32_spill]] %s1894_s5  ;;  %p1047_p1 = scmp.lt.u32.totalorder %s1043_s29, %s1889_s0 }
   0x4   :  { %1921 = sst [smem:[#allocation33_spill]] %s1895_s6 }
   0x5   :  { %1922 = sst [smem:[#allocation34_spill]] %s1896_s7  ;;  %p1049_p2 = pnand %p1047_p1, %p1044_p0 }
   0x6   :  { %1923 = sst [smem:[#allocation35_spill]] %s1897_s8 }
   0x7   :  { %1052 = shalt.err (!%p1049_p2)  }
   0x8   :  { %s1365_s12 = smov [#allocation3]  }
   0x9   :  { %15 = dma.hbm_to_smem %s1889_s0, 32, %s1365_s12, [#allocation2] }
   0xa   :  { %1299 = dma.done.wait [#allocation2], 32 }
   0xb   :  { %1300 = vsyncadd [#allocation2], 4294967264 }
   0xc   :  { %17 = sfence }
   0xd   :  { %18 = vsyncpa [#allocation5], 0 }
   0xe   :  { %20 = vsyncpa [#allocation5 + $0x1], 0 }
   0xf   :  { %21 = vsyncpa [#allocation8], 0 }
  0x10   :  { %23 = vsyncpa [#allocation8 + $0x1], 0 }
  0x11   :  { %24 = vsyncpa [#allocation6], 0 }
  0x12   :  { %26 = vsyncpa [#allocation6 + $0x1], 0 }
  0x13   :  { %27 = vsyncpa [#allocation12], 0 }
  0x14   :  { %29 = vsyncpa [#allocation12 + $0x1], 0 }
  0x15   :  { %30 = vsyncpa [#allocation15], 0 }
  0x16   :  { %32 = vsyncpa [#allocation15 + $0x1], 0  ;;  %s1431_s15 = smov 0   ;;  %s1433_s16 = smov 0  }
  0x17   :  { %s1435_s17 = smov 0   ;;  %s1437_s0 = smov 0  }
  0x18   :  { %s1439_s18 = smov 0   ;;  %s1441_s19 = smov 0  }
  0x19   :  { %s1443_s20 = smov 0   ;;  %s1445_s21 = smov 0  }
  0x1a   :  { %s1447_s22 = smov 0   ;;  %s1449_s23 = smov 0  }
  0x1b   :  { %s1451_s24 = smov 0  }
  0x1c LB: > { %1924 = sst [smem:[#allocation22_spill]] %s1323_s15  ;;  %s1487_s25 = sadd.s32 4294967295, %s1363_s24   ;;  %s1363_s24 = sphi %s1451_s24, %s38_s24   ;;  %s1359_s23 = sphi %s1449_s23, %s1967_s23   ;;  %s1355_s22 = sphi %s1447_s22, %s1966_s22   ;;  %s1351_s21 = sphi %s1445_s21, %s1965_s21   ;;  %s1347_s20 = sphi %s1443_s20, %s1964_s20   ;;  %s1343_s19 = sphi %s1441_s19, %s1963_s19   ;;  %s1339_s18 = sphi %s1439_s18, %s1972_s18   ;;  %s1335_s0 = sphi %s1437_s0, %s1971_s0   ;;  %s1331_s17 = sphi %s1435_s17, %s1970_s17   ;;  %s1327_s16 = sphi %s1433_s16, %s1969_s16   ;;  %s1323_s15 = sphi %s1431_s15, %s1968_s15  }
  0x1d   : > { %1925 = sst [smem:[#allocation23_spill]] %s1343_s19  ;;  %s1902_s26 = sadd.s32 4294967294, %s1363_s24  }
  0x1e   : > { %1926 = sst [smem:[#allocation24_spill]] %s1355_s22  ;;  %s47_s27 = sadd.s32 1, %s1355_s22 }
  0x1f   : > { %1927 = sst [smem:[#allocation25_spill]] %s1359_s23  ;;  %s50_s28 = sadd.s32 1, %s1359_s23 }
  0x20   : > { %p48_p3 = scmp.ge.s32.totalorder %s47_s27, 2  ;;  %p1911_p4 = scmp.eq.s32.totalorder %s1363_s24, 0 }
  0x21   : > { %p1910_p5 = scmp.eq.s32.totalorder %s1487_s25, 0  ;;  %s85_s29 = sadd.s32 1, %s1331_s17 }
  0x22   : > { %s1974_s27 = smov (%p48_p3, %s47_s27), 0  ;;  %s1976_s28 = smov (!%p48_p3, %s50_s28), %s1359_s23 }
  0x23   : > { %1928 = sst [smem:[#allocation26_spill]] %s1974_s27  ;;  %s1500_s30 = ssub.s32 %s1355_s22, %s1974_s27 }
  0x24   : > { %p92_p6 = scmp.ne.s32.totalorder %s1331_s17, %s1327_s16  ;;  %p52_p7 = scmp.ge.s32.totalorder %s1976_s28, 2 }
  0x25   : > { %p98_p10 = scmp.ne.s32.totalorder %s1327_s16, %s1323_s15  ;;  %p180_p12 = scmp.eq.s32.totalorder %s1487_s25, 3 }
  0x26   : > { %p1507_p9 = por %p92_p6, %p1911_p4  ;;  %s1978_s28 = smov (%p52_p7, %s1976_s28), 0 }
  0x27   : > { %1930 = sst [smem:[#allocation27_spill]] %s1978_s28  ;;  %p1517_p11 = por %p98_p10, %p1910_p5 }
  0x28   : > { %s80_s11 = ssub.s32 %s1359_s23, %s1978_s28  ;;  %p186_p13 = scmp.eq.s32.totalorder %s1902_s26, 3 }
  0x29   : > { %s1931_s10 = scalar_select %p1517_p11, 1, 0 }
  0x2a   : > { %s82_s12 = sor.u32 %s80_s11, %s1500_s30  ;;  %p1527_p0 = por %p180_p12, %p92_p6 }
  0x2b   : > { %p83_p1 = scmp.eq.s32.totalorder %s82_s12, 0  ;;  %p1531_p2 = por %p186_p13, %p98_p10 }
  0x2c   : > { %s1932_s13 = scalar_select %p1527_p0, 1, 0 }
  0x2d   : > { %s1934_s14 = scalar_select %p1531_p2, 1, 0 }
  0x2e   : > { %1933 = sst [smem:[#allocation28_spill]] %s1932_s13  ;;  %p1909_p3 = scmp.lt.s32.totalorder %s1363_s24, 4 }
  0x2f   : > { %s1537_s27 = scalar_select %p83_p1, %s1331_s17, %s85_s29  }
  0x30   : > { %s308_s15 = sand.u32 1, %s1363_s24   ;;  %s310_s28 = sand.u32 1, %s1331_s17  }
  0x31   : > { %s1541_s8 = sshll.u32 %s310_s28, 2  ;;  %s871_s11 = sshll.u32 %s1359_s23, 1 }
  0x32   : > { %s317_s26 = sadd.s32 %s1355_s22, %s871_s11  ;;  %s312_s7 = scalar_lea.vmem [#allocation7], %s1541_s8 }
  0x33   : > { %s321_s5 = sshll.u32 %s312_s7, 4  ;;  %s872_s6 = sshll.u32 %s317_s26, 6  ;;  %s1546_s5 = int_to_ptr.vmem [resolvable:$true] %s321_s5 }
  0x34   : > { %s1935_s2 = sld [smem:[#allocation30_spill]]  ;;  %p1557_p6 = pnand %p1909_p3, %p1507_p9 }
  0x35   : > { %s1564_s26 = scalar_lea.hbm %s1892_s3, %s872_s6  ;;  %s1567_s13 = scalar_lea.sflag [#allocation8], %s308_s15 }
  0x36   : > { %p1915_p12 = pneg %p1557_p6 }
  0x3a   : > { %s1551_s4 = scalar_lea.hbm %s1935_s2, %s872_s6  ;;  %s1058_s23 = scalar_lea.hbm %s1935_s2, 256 }
  0x3b   : > { %s1053_s9 = scalar_lea.hbm %s1551_s4, 64  ;;  %p1059_p1 = scmp.lt.u32.totalorder %s1551_s4, %s1935_s2 }
  0x3c   : > { %p1054_p10 = scmp.ne.s32.totalorder %s1551_s4, %s1053_s9  ;;  %p1060_p3 = scmp.lt.u32.totalorder %s1058_s23, %s1053_s9 }
  0x3d   : > { %p1062_p4 = scmp.lt.u32.totalorder %s1053_s9, %s1551_s4 }
  0x3e   : > { %p1056_p9 = pnand %p1915_p12, %p1054_p10  ;;  %p1061_p5 = por %p1060_p3, %p1059_p1 }
  0x40   : > { %p1057_p13 = pneg %p1056_p9  ;;  %p1063_p8 = por %p1062_p4, %p1061_p5 }
  0x42   : > { %p1064_p7 = pnand %p1063_p8, %p1057_p13 }
  0x44   : > { %1067 = shalt.err (!%p1064_p7)
}
  0x45   : > { %s1068_s6 = scalar_lea.vmem %s1546_s5, 64  ;;  %s1366_s15 = smov [#allocation7]  }
  0x46   : > { %p1069_p10 = scmp.ne.s32.totalorder %s1546_s5, %s1068_s6  ;;  %s1073_s11 = sshll.u32 %s1366_s15, 4  ;;  %s1074_s11 = int_to_ptr.vmem [resolvable:$false] %s1073_s11 }
  0x47   : > { %s1075_s12 = scalar_lea.vmem %s1074_s11, 128  ;;  %p1076_p0 = scmp.lt.s32.totalorder %s1546_s5, %s1074_s11 }
  0x48   : > { %p1071_p9 = pnand %p1069_p10, %p1915_p12  ;;  %p1077_p3 = scmp.lt.s32.totalorder %s1075_s12, %s1068_s6 }
  0x4a   : > { %p1072_p2 = pneg %p1071_p9  ;;  %p1078_p1 = por %p1077_p3, %p1076_p0 }
  0x4c   : > { %p1079_p4 = pnand %p1078_p1, %p1072_p2 }
  0x4e   : > { %1082 = shalt.err (!%p1079_p4)
}
  0x4f   : > { %924 = dma.hbm_to_vmem [thread:$0]  (!%p1557_p6), %s1551_s4, 64, %s1546_s5, %s1567_s13  }
  0x50   : > { %p356_p5 = scmp.lt.s32.totalorder %s1363_s24, 5  ;;  %p1937_p8 = scmp.ge.s32.totalorder %s1363_s24, 1 }
  0x51   : > { %s57_s9 = sadd.s32 1, %s1343_s19  ;;  %p64_p2 = scmp.ne.s32.totalorder %s1343_s19, %s1339_s18 }
  0x52   : > { %p1598_p0 = pnand %p1937_p8, %p356_p5  ;;  %p1939_p7 = scmp.eq.s32.totalorder %s1500_s30, 0 }
  0x53   : > { %p1941_p13 = scmp.eq.s32.totalorder %s1363_s24, 0  ;;  %p70_p9 = scmp.ne.s32.totalorder %s1339_s18, %s1335_s0 }
  0x54   : > { %s1938_s23 = scalar_select %p1598_p0, 1, 0 }
  0x55   : > { %s1608_s29 = scalar_select %p1939_p7, %s1343_s19, %s57_s9  }
  0x56   : > { %p66_p10 = por %p1941_p13, %p64_p2  ;;  %s290_s7 = sand.u32 1, %s1343_s19  }
  0x57   : > { %1940 = sst [smem:[#allocation29_spill]] %s1608_s29  ;;  %s869_s6 = sshll.u32 %s1355_s22, 5 }
  0x58   : > { %p1942_p3 = scmp.eq.s32.totalorder %s1487_s25, 0  ;;  %s868_s5 = sshll.u32 %s290_s7, 1 }
  0x59   : > { %s1625_s12 = scalar_lea.hbm %s1890_s1, %s869_s6  ;;  %p1944_p4 = scmp.lt.s32.totalorder %s1363_s24, 4 }
  0x5a   : > { %p1618_p1 = por %p1942_p3, %p70_p9  ;;  %s294_s0 = scalar_lea.vmem [#allocation4], %s868_s5 }
  0x5b   : > { %p1629_p5 = pnand %p1944_p4, %p66_p10  ;;  %s301_s9 = sshll.u32 %s294_s0, 4  ;;  %s1636_s9 = int_to_ptr.vmem [resolvable:$true] %s301_s9 }
  0x5c   : > { %s1943_s4 = scalar_select %p1618_p1, 1, 0 }
  0x5d   : > { %s332_s2 = scalar_lea.vmem [#allocation9], %s1541_s8  ;;  %s291_s6 = scalar_lea.sflag [#allocation5], %s290_s7 }
  0x5e   : > { %s1634_s22 = sshll.u32 %s332_s2, 4  ;;  %s1083_s15 = scalar_lea.hbm %s1625_s12, 32  ;;  %s342_s22 = int_to_ptr.vmem [resolvable:$true] %s1634_s22 }
  0x5f   : > { %p1084_p8 = scmp.ne.s32.totalorder %s1625_s12, %s1083_s15  ;;  %p1085_p2 = pneg %p1629_p5 }
  0x60   : > { %s1088_s19 = scalar_lea.hbm %s1890_s1, 64  ;;  %p1089_p10 = scmp.lt.u32.totalorder %s1625_s12, %s1890_s1 }
  0x61   : > { %p1086_p7 = pnand %p1085_p2, %p1084_p8  ;;  %p1090_p9 = scmp.lt.u32.totalorder %s1088_s19, %s1083_s15 }
  0x62   : > { %p1092_p4 = scmp.lt.u32.totalorder %s1083_s15, %s1625_s12 }
  0x63   : > { %p1087_p13 = pneg %p1086_p7  ;;  %p1091_p3 = por %p1090_p9, %p1089_p10 }
  0x65   : > { %p1093_p12 = por %p1092_p4, %p1091_p3 }
  0x67   : > { %p1094_p11 = pnand %p1093_p12, %p1087_p13 }
  0x69   : > { %1097 = shalt.err (!%p1094_p11)
}
  0x6a   : > { %s1098_s2 = scalar_lea.vmem %s1636_s9, 32  ;;  %s1367_s8 = smov [#allocation4]  }
  0x6b   : > { %p1099_p8 = scmp.ne.s32.totalorder %s1636_s9, %s1098_s2  ;;  %s1103_s29 = sshll.u32 %s1367_s8, 4  ;;  %s1104_s29 = int_to_ptr.vmem [resolvable:$false] %s1103_s29 }
  0x6c   : > { %s1105_s7 = scalar_lea.vmem %s1104_s29, 64  ;;  %p1106_p0 = scmp.lt.s32.totalorder %s1636_s9, %s1104_s29 }
  0x6d   : > { %p1101_p7 = pnand %p1099_p8, %p1085_p2  ;;  %p1107_p10 = scmp.lt.s32.totalorder %s1105_s7, %s1098_s2 }
  0x6f   : > { %p1102_p1 = pneg %p1101_p7  ;;  %p1108_p9 = por %p1107_p10, %p1106_p0 }
  0x71   : > { %p1109_p3 = pnand %p1108_p9, %p1102_p1 }
  0x73   : > { %1112 = shalt.err (!%p1109_p3)
}
  0x74   : > { %921 = dma.hbm_to_vmem [thread:$0]  (!%p1629_p5), %s1625_s12, 32, %s1636_s9, %s291_s6  }
  0x75   : > { %s1113_s19 = scalar_lea.hbm %s1564_s26, 64  ;;  %p1946_p12 = pneg %p1557_p6 }
  0x76   : > { %p1114_p11 = scmp.ne.s32.totalorder %s1564_s26, %s1113_s19  ;;  %s1118_s30 = scalar_lea.hbm %s1892_s3, 256 }
  0x77   : > { %p1119_p1 = scmp.lt.u32.totalorder %s1564_s26, %s1892_s3  ;;  %p1120_p13 = scmp.lt.u32.totalorder %s1118_s30, %s1113_s19 }
  0x78   : > { %p1116_p2 = pnand %p1114_p11, %p1946_p12  ;;  %p1122_p8 = scmp.lt.u32.totalorder %s1113_s19, %s1564_s26 }
  0x79   : > { %p1121_p4 = por %p1120_p13, %p1119_p1 }
  0x7a   : > { %p1117_p0 = pneg %p1116_p2 }
  0x7b   : > { %p1123_p7 = por %p1122_p8, %p1121_p4 }
  0x7d   : > { %p1124_p5 = pnand %p1123_p7, %p1117_p0 }
  0x7f   : > { %1127 = shalt.err (!%p1124_p5)
}
  0x80   : > { %s1128_s12 = scalar_lea.vmem %s342_s22, 64  ;;  %p1947_p9 = pmov %p1946_p12 }
  0x81   : > { %p1129_p10 = scmp.ne.s32.totalorder %s342_s22, %s1128_s12  ;;  %s1368_s9 = smov [#allocation9]  }
  0x82   : > { %s1133_s6 = sshll.u32 %s1368_s9, 4  ;;  %s1134_s6 = int_to_ptr.vmem [resolvable:$false] %s1133_s6 }
  0x83   : > { %p1131_p3 = pnand %p1129_p10, %p1947_p9  ;;  %s1135_s2 = scalar_lea.vmem %s1134_s6, 128 }
  0x84   : > { %p1136_p12 = scmp.lt.s32.totalorder %s342_s22, %s1134_s6  ;;  %p1137_p2 = scmp.lt.s32.totalorder %s1135_s2, %s1128_s12 }
  0x85   : > { %p1132_p11 = pneg %p1131_p3 }
  0x86   : > { %p1138_p1 = por %p1137_p2, %p1136_p12 }
  0x88   : > { %p1139_p13 = pnand %p1138_p1, %p1132_p11 }
  0x8a   : > { %1142 = shalt.err (!%p1139_p13)
}
  0x8b   : > { %927 = dma.hbm_to_vmem [thread:$0]  (!%p1557_p6), %s1564_s26, 64, %s342_s22, %s1567_s13  }
  0x8c   : > { %p1948_p0 = scmp.ne.s32.totalorder %s1938_s23, 0 }
  0x8d   : > { %s362_s8 = sand.u32 (!%p1948_p0), 1, %s1339_s18   ;;  %p1949_p4 = scmp.ne.s32.totalorder (!%p1948_p0), %s1943_s4, 0 }
  0x8e   : > { %360 = sbr.rel (%p1948_p0) target bundleno = 416 (0x1a0), region = 36  ;;  %s1687_s29 = sshll.u32 (!%p1948_p0), %s362_s8, 1 }
  0x8f   : > { %s363_s7 = scalar_lea.sflag (!%p1948_p0), [#allocation5], %s362_s8  ;;  %s366_s19 = scalar_lea.vmem (!%p1948_p0), [#allocation4], %s1687_s29 }
  0x95   : > { %1302 = dma.done.wait (%p1949_p4), %s363_s7, 32  }
  0x96   : > { %1304 = vsyncadd (%p1949_p4), %s363_s7, 4294967264  ;;  %s371_s22 = sand.u32 1, %s1487_s25   ;;  %s1696_s28 = sand.u32 1, %s1327_s16  }
  0x97   : > { %s1699_s26 = sshll.u32 %s1696_s28, 2  ;;  %s372_s13 = scalar_lea.sflag [#allocation8], %s371_s22 }
  0x98   : > { %s375_s23 = scalar_lea.vmem [#allocation7], %s1699_s26  ;;  %p1950_p6 = scmp.ne.s32.totalorder %s1931_s10, 0 }
  0x9a   : > { %1306 = dma.done.wait (%p1950_p6), %s372_s13, 128  }
  0x9b   : > { %1308 = vsyncadd (%p1950_p6), %s372_s13, 4294967168  ;;  %v455_v0 = vld [vmem:[%s375_s23] sm:$0xf]  ;;  %vm475_vm0 = vcmask 1043456   ;;  %v1369_v5 = vmov 0   ;;  %p446_p8 = scmp.lt.s32.totalorder %s1351_s21, 1  ;;  %v499_v17 = vlaneseq }
  0x9c   : > { %v884_v1 = vmul.f32 -1.442695, %v455_v0  ;;  %p448_p7 = scmp.lt.s32.totalorder %s1347_s20, 1  ;;  %s1951_s0 = sld [smem:[#allocation31_spill]]  ;;  %v513_v27 = vld [vmem:[%s366_s19] sm:$0x1] }
  0x9d   : > { %s447_s10 = scalar_select %p446_p8, %s1351_s21, 1  ;;  %v500_v18 = vshrl.u32 %v499_v17, 7  ;;  %v514_v28 = vld [vmem:[%s366_s19 + $0x1] sm:$0x1] }
  0x9e   : > { %1033 = vpow2.f32 %v884_v1  ;;  %s449_s4 = scalar_select %p448_p7, %s1347_s20, 1 }
  0x9f   : > { %s883_s15 = sshll.u32 %s447_s10, 1  ;;  %v501_v19 = vsub.s32 0, %v500_v18  ;;  %s886_s9 = sshll.u32 %s1351_s21, 7 }
  0xa0   : > { %s451_s11 = sadd.s32 %s883_s15, %s449_s4  ;;  %s520_s6 = sadd.s32 1, %s886_s9 }
  0xa1   : > { %s517_s2 = sld [smem:[#allocation3 + %s886_s9]]  ;;  %s384_s7 = scalar_lea.vmem [#allocation9], %s1699_s26 }
  0xa2   : > { %s452_s12 = scalar_lea.vmem %s1951_s0, %s451_s11  ;;  %s521_s8 = sld [smem:[#allocation3 + %s520_s6]]  ;;  %v515_v23 = vld [vmem:[%s384_s7] sm:$0xf] }
  0xa3   : > { %v462_v13 = vld [vmem:[%s452_s12] sm:$0x1]  ;;  %v530_v24 = vrot.slane %v515_v23, 1  ;;  %v537_v25 = vrot.slane %v515_v23, 2  ;;  %v543_v26 = vrot.slane %v515_v23, 3  ;;  %v524_v30 = vsub.f32 %v513_v27, %v515_v23  ;;  %s892_s4 = sshll.u32 %s1351_s21, 1 }
  0xa4   : > { %v885_v14 = vmul.f32 -1.442695, %v462_v13  ;;  %s1727_s11 = sadd.s32 %s1347_s20, %s892_s4  ;;  %s431_s29 = scalar_lea.vmem [#allocation11], %s1696_s28 }
  0xa5   : > { %v532_v32 = vsub.f32 %v514_v28, %v530_v24  ;;  %v539_v33 = vadd.f32 %v537_v25, %v513_v27  ;;  %v545_v34 = vadd.f32 %v543_v26, %v514_v28  ;;  %s895_s19 = sshll.u32 %s1727_s11, 4  ;;  %s1952_s30 = sld [smem:[#allocation28_spill]]  ;;  %v525_v38 = vmax.f32 %v524_v30, 0.0 }
  0xa6   : > { %s594_s5 = sshll.u32 %s431_s29, 4  ;;  %s1953_s12 = sld [smem:[#allocation33_spill]]  ;;  %s1736_s5 = int_to_ptr.vmem [resolvable:$true] %s594_s5 }
  0xa7   : > { %s518_s13 = scvt.s32.f32 %s517_s2  ;;  %v533_v39 = vmax.f32 %v532_v32, 0.0  ;;  %v540_v40 = vmax.f32 %v539_v33, 0.0  ;;  %v546_v41 = vmax.f32 %v545_v34, 0.0  ;;  %s1742_s20 = scalar_lea.sflag [#allocation12], %s371_s22 }
  0xa8   : > { %v1034_v2 = vpop.eup %1033  ;;  %s522_s23 = scvt.s32.f32 %s521_s8  ;;  %s1143_s6 = scalar_lea.vmem %s1736_s5, 16 }
  0xa9   : > { %v459_v3 = vadd.f32 1.0, %v1034_v2  ;;  %s1721_s10 = sadd.f32 -1.0, %s518_s13  ;;  %p1144_p5 = scmp.ne.s32.totalorder %s1736_s5, %s1143_s6 }
  0xaa   : > { %s1724_s15 = sadd.f32 -1.0, %s522_s23  ;;  %s1370_s2 = smov [#allocation11]  }
  0xab   : > { %1035 = vrcp.f32 %v459_v3  ;;  %v526_v42 = vstv %s1721_s10  ;;  %p1954_p10 = scmp.ne.s32.totalorder %s1952_s30, 0  ;;  %s1147_s8 = sshll.u32 %s1370_s2, 4  ;;  %s1148_s8 = int_to_ptr.vmem [resolvable:$false] %s1147_s8 }
  0xac   : > { %1037 = vpow2.f32 %v885_v14  ;;  %s1734_s9 = scalar_lea.hbm %s1953_s12, %s895_s19  ;;  %v534_v43 = vstv %s1724_s15  ;;  %s1149_s7 = scalar_lea.vmem %s1148_s8, 32 }
  0xad   : > { %p1145_p9 = pnand %p1144_p5, %p1954_p10  ;;  %p1150_p11 = scmp.lt.s32.totalorder %s1736_s5, %s1148_s8 }
  0xae   : > { %p1151_p12 = scmp.lt.s32.totalorder %s1149_s7, %s1143_s6 }
  0xaf   : > { %p1146_p3 = pneg %p1145_p9 }
  0xb0   : > { %p1152_p2 = por %p1151_p12, %p1150_p11 }
  0xb2   : > { %p1153_p1 = pnand %p1152_p2, %p1146_p3 }
  0xb5   : > { %v1036_v4 = vpop.eup %1035 }
  0xb6   : > { %vm469_vm1 = vcmp.gt.f32.partialorder %v1036_v4, 0.05  ;;  %v1038_v15 = vpop.eup %1037 }
  0xb7   : > { %v474_v6 = vsel %vm469_vm1, 1, %v1369_v5  ;;  %vm470_vm2 = vmpackc.low %vm469_vm1, %vm469_vm1  ;;  %v466_v16 = vadd.f32 1.0, %v1038_v15 }
  0xb8   : > { %v476_v7 = vsel %vm475_vm0, %v474_v6, 0  ;;  %vm471_vm3 = vmpackc.even %vm470_vm2, %vm470_vm2 }
  0xb9   : > { %v478_v8 = vshrl.u32 %v476_v7, 16  ;;  %v472_v9 = vsel %vm471_vm3, 16843009, %v1369_v5  ;;  %v477_v10 = vand.u32 65535, %v476_v7  ;;  %1039 = vrcp.f32 %v466_v16 }
  0xba   : > { %473 = vst [vmem:[%s431_s29] sm:$0x1] %v472_v9 }
  0xbb   : > { %v480_v11 = vcvt.s32.f32 %v478_v8  ;;  %v479_v12 = vcvt.s32.f32 %v477_v10 }
  0xbd   : > { %483 = vadd.xlane.f32.xlu0 %v480_v11 }
  0xc1   : > { %481 = vadd.xlane.f32.xlu0 %v479_v12 }
  0xc3   : > { %v1040_v20 = vpop.eup %1039 }
  0xc4   : > { %v502_v21 = vrot.slane %v1040_v20, %v501_v19 }
  0xc6   : > { %v504_v22 = vmul.f32 %v1036_v4, %v502_v21 }
  0xc8   : > { %1041 = vrsqrt.f32 %v504_v22  ;;  %vm507_vm4 = vcmp.eq.f32.partialorder %v504_v22, inf  ;;  %v510_v35 = vand.u32 2147483648, %v504_v22  ;;  %vm509_vm5 = vcmp.eq.f32.partialorder %v504_v22, 0.0 }
  0xd2   : > { %v1042_v29 = vpop.eup %1041 }
  0xd3   : > { %v506_v31 = vmul.f32 %v1042_v29, %v504_v22 }
  0xd5   : > { %v508_v36 = vsel %vm507_vm4, %v504_v22, %v506_v31 }
  0xd6   : > { %v511_v37 = vsel %vm509_vm5, %v510_v35, %v508_v36 }
  0xd7   : > { %1156 = shalt.err (!%p1153_p1)
}
  0xd8   : > { %s1157_s25 = scalar_lea.hbm %s1734_s9, 16  ;;  %s1161_s23 = scalar_lea.hbm %s1953_s12, 64 }
  0xd9   : > { %p1158_p13 = scmp.ne.s32.totalorder %s1734_s9, %s1157_s25  ;;  %p1162_p6 = scmp.lt.u32.totalorder %s1734_s9, %s1953_s12 }
  0xda   : > { %p1163_p8 = scmp.lt.u32.totalorder %s1161_s23, %s1157_s25  ;;  %p1165_p5 = scmp.lt.u32.totalorder %s1157_s25, %s1734_s9 }
  0xdb   : > { %p1159_p0 = pnand %p1158_p13, %p1954_p10 }
  0xdc   : > { %p1164_p7 = por %p1163_p8, %p1162_p6 }
  0xdd   : > { %p1160_p4 = pneg %p1159_p0 }
  0xde   : > { %p1166_p9 = por %p1165_p5, %p1164_p7 }
  0xe0   : > { %p1167_p3 = pnand %p1166_p9, %p1160_p4 }
  0xe2   : > { %1170 = shalt.err (!%p1167_p3)
}
  0xe3   : > { %911 = dma.vmem_to_hbm [thread:$0]  (%p1954_p10), %s1736_s5, 16, %s1734_s9, %s1742_s20   ;;  %v527_v44 = vmin.f32 %v526_v42, %v525_v38  ;;  %v535_v45 = vmin.f32 %v534_v43, %v533_v39  ;;  %v541_v46 = vmin.f32 %v526_v42, %v540_v40  ;;  %v547_v47 = vmin.f32 %v534_v43, %v546_v41 }
  0xe4   : > { %s425_s15 = scalar_lea.vmem [#allocation10], %s1699_s26  ;;  %s893_s29 = sshll.u32 %s1727_s11, 6 }
  0xe5   : > { %512 = vst [vmem:[%s425_s15] sm:$0xf] %v511_v37  ;;  %s1955_s0 = sld [smem:[#allocation32_spill]]  ;;  %s579_s8 = sshll.u32 %s425_s15, 4  ;;  %s580_s8 = int_to_ptr.vmem [resolvable:$true] %s579_s8 }
  0xe6   : > { %s550_s7 = scalar_lea.sflag [#allocation6], %s1696_s28  ;;  %s1171_s25 = scalar_lea.vmem %s580_s8, 64 }
  0xe7   : > { %p1172_p11 = scmp.ne.s32.totalorder %s580_s8, %s1171_s25  ;;  %s1371_s5 = smov [#allocation10]  }
  0xe8   : > { %s1175_s9 = sshll.u32 %s1371_s5, 4  ;;  %s1176_s9 = int_to_ptr.vmem [resolvable:$false] %s1175_s9 }
  0xe9   : > { %p1173_p12 = pnand %p1172_p11, %p1954_p10  ;;  %s1177_s22 = scalar_lea.vmem %s1176_s9, 128 }
  0xea   : > { %p1178_p1 = scmp.lt.s32.totalorder %s580_s8, %s1176_s9  ;;  %p1179_p13 = scmp.lt.s32.totalorder %s1177_s22, %s1171_s25 }
  0xeb   : > { %s1956_s6 = smov %s1955_s0  ;;  %s1773_s2 = scalar_lea.hbm %s1955_s0, %s893_s29 }
  0xec   : > { %p1174_p2 = pneg %p1173_p12  ;;  %p1180_p0 = por %p1179_p13, %p1178_p1 }
  0xee   : > { %p1181_p4 = pnand %p1180_p0, %p1174_p2 }
  0xf0   : > { %1184 = shalt.err (!%p1181_p4)
}
  0xf1   : > { %s1185_s13 = scalar_lea.hbm %s1773_s2, 64  ;;  %s1189_s4 = scalar_lea.hbm %s1956_s6, 256 }
  0xf2   : > { %p1186_p6 = scmp.ne.s32.totalorder %s1773_s2, %s1185_s13  ;;  %p1190_p5 = scmp.lt.u32.totalorder %s1773_s2, %s1956_s6 }
  0xf3   : > { %p1191_p9 = scmp.lt.u32.totalorder %s1189_s4, %s1185_s13  ;;  %p1193_p11 = scmp.lt.u32.totalorder %s1185_s13, %s1773_s2 }
  0xf4   : > { %p1187_p8 = pnand %p1186_p6, %p1954_p10 }
  0xf5   : > { %p1192_p3 = por %p1191_p9, %p1190_p5 }
  0xf6   : > { %p1188_p7 = pneg %p1187_p8 }
  0xf7   : > { %p1194_p12 = por %p1193_p11, %p1192_p3 }
  0xf9   : > { %p1195_p2 = pnand %p1194_p12, %p1188_p7 }
  0xfb   : > { %1198 = shalt.err (!%p1195_p2)
}
  0xfc   : > { %910 = dma.vmem_to_hbm [thread:$0]  (%p1954_p10), %s580_s8, 64, %s1773_s2, %s550_s7  }
  0xfd   : > { %s1957_s25 = sld [smem:[#allocation34_spill]]  ;;  %s438_s9 = scalar_lea.vmem [#allocation13], %s1699_s26 }
  0xfe   : > { %528 = vst [vmem:[%s438_s9] sm:$0x1] %v527_v44  ;;  %536 = vst [vmem:[%s438_s9 + $0x1] sm:$0x1] %v535_v45  ;;  %s609_s22 = sshll.u32 %s438_s9, 4  ;;  %s1372_s23 = smov [#allocation13]   ;;  %s610_s22 = int_to_ptr.vmem [resolvable:$true] %s609_s22 }
  0xff   : > { %542 = vst [vmem:[%s438_s9 + $0x2] sm:$0x1] %v541_v46  ;;  %548 = vst [vmem:[%s438_s9 + $0x3] sm:$0x1] %v547_v47  ;;  %s1199_s13 = scalar_lea.vmem %s610_s22, 64  ;;  %s1203_s2 = sshll.u32 %s1372_s23, 4  ;;  %s1204_s2 = int_to_ptr.vmem [resolvable:$false] %s1203_s2 }
 0x100   : > { %p1200_p1 = scmp.ne.s32.totalorder %s610_s22, %s1199_s13  ;;  %s1205_s8 = scalar_lea.vmem %s1204_s2, 128 }
 0x101   : > { %p1206_p4 = scmp.lt.s32.totalorder %s610_s22, %s1204_s2  ;;  %p1207_p6 = scmp.lt.s32.totalorder %s1205_s8, %s1199_s13 }
 0x102   : > { %p1201_p13 = pnand %p1200_p1, %p1954_p10 }
 0x103   : > { %s1798_s5 = scalar_lea.hbm %s1957_s25, %s893_s29  ;;  %p1208_p8 = por %p1207_p6, %p1206_p4 }
 0x104   : > { %p1202_p0 = pneg %p1201_p13 }
 0x106   : > { %p1209_p7 = pnand %p1208_p8, %p1202_p0 }
 0x108   : > { %1212 = shalt.err (!%p1209_p7)
}
 0x109   : > { %s1213_s26 = scalar_lea.hbm %s1798_s5, 64  ;;  %s1217_s10 = scalar_lea.hbm %s1957_s25, 256 }
 0x10a   : > { %p1214_p5 = scmp.ne.s32.totalorder %s1798_s5, %s1213_s26  ;;  %p1218_p11 = scmp.lt.u32.totalorder %s1798_s5, %s1957_s25 }
 0x10b   : > { %p1219_p12 = scmp.lt.u32.totalorder %s1217_s10, %s1213_s26  ;;  %p1221_p1 = scmp.lt.u32.totalorder %s1213_s26, %s1798_s5 }
 0x10c   : > { %p1215_p9 = pnand %p1214_p5, %p1954_p10 }
 0x10d   : > { %p1220_p2 = por %p1219_p12, %p1218_p11 }
 0x10e   : > { %p1216_p3 = pneg %p1215_p9 }
 0x10f   : > { %p1222_p13 = por %p1221_p1, %p1220_p2 }
 0x111   : > { %p1223_p0 = pnand %p1222_p13, %p1216_p3 }
 0x113   : > { %1226 = shalt.err (!%p1223_p0)
}
 0x114   : > { %912 = dma.vmem_to_hbm [thread:$0]  (%p1954_p10), %s610_s22, 64, %s1798_s5, %s1742_s20  }
 0x115   : > { %s882_s19 = sshll.u32 %s1696_s28, 3  ;;  %s899_s20 = sshll.u32 %s1727_s11, 7 }
 0x116   : > { %s445_s21 = scalar_lea.vmem [#allocation14], %s882_s19  ;;  %s1958_s13 = sld [smem:[#allocation35_spill]] }
 0x117   : > { %s624_s0 = sshll.u32 %s445_s21, 4  ;;  %s564_s2 = scalar_lea.sflag [#allocation15], %s1696_s28  ;;  %s1821_s0 = int_to_ptr.vmem [resolvable:$true] %s624_s0 }
 0x118   : > { %s1227_s8 = scalar_lea.vmem %s1821_s0, 128  ;;  %s1373_s11 = smov [#allocation14]  }
 0x119   : > { %p1228_p4 = scmp.ne.s32.totalorder %s1821_s0, %s1227_s8  ;;  %s1231_s26 = sshll.u32 %s1373_s11, 4  ;;  %s1232_s26 = int_to_ptr.vmem [resolvable:$false] %s1231_s26 }
 0x11a   : > { %s1233_s29 = scalar_lea.vmem %s1232_s26, 256  ;;  %p1234_p7 = scmp.lt.s32.totalorder %s1821_s0, %s1232_s26 }
 0x11b   : > { %p1229_p6 = pnand %p1228_p4, %p1954_p10  ;;  %p1235_p5 = scmp.lt.s32.totalorder %s1233_s29, %s1227_s8 }
 0x11c   : > { %s1826_s23 = scalar_lea.hbm %s1958_s13, %s899_s20 }
 0x11d   : > { %p1230_p8 = pneg %p1229_p6  ;;  %p1236_p9 = por %p1235_p5, %p1234_p7 }
 0x11f   : > { %p1237_p3 = pnand %p1236_p9, %p1230_p8 }
 0x14a   : > { %v484_v48 = vpop.xlane.xlu0 %483 }
 0x14b   : > { %v486_v49 = vcvt.f32.s32 %v484_v48 }
 0x14d   : > { %v487_v51 = vshll.u32 %v486_v49, 16 }
 0x14e   : > { %v482_v50 = vpop.xlane.xlu0 %481 }
 0x14f   : > { %v485_v52 = vcvt.f32.s32 %v482_v50 }
 0x151   : > { %v488_v53 = vadd.s32 %v487_v51, %v485_v52 }
 0x153   : > { %v489_v54 = vrot.slane %v488_v53, 4 }
 0x155   : > { %v490_v55 = vadd.s32 %v489_v54, %v488_v53 }
 0x157   : > { %v491_v56 = vrot.slane %v490_v55, 2 }
 0x159   : > { %v492_v57 = vadd.s32 %v491_v56, %v490_v55 }
 0x15b   : > { %v493_v58 = vrot.slane %v492_v57, 1 }
 0x15d   : > { %v494_v59 = vadd.s32 %v493_v58, %v492_v57 }
 0x15f   : > { %902 = vpush %v494_v59 }
 0x190   : > { %s903_s5 = spop %902 }
 0x191   : > { %v496_v60 = vstv %s903_s5 }
 0x192   : > { %497 = vst [vmem:[%s445_s21] sm:$0xff] %v496_v60 }
 0x193   : > { %1240 = shalt.err (!%p1237_p3)
}
 0x194   : > { %s1241_s28 = scalar_lea.hbm %s1826_s23, 128  ;;  %s1245_s4 = scalar_lea.hbm %s1958_s13, 512 }
 0x195   : > { %p1242_p11 = scmp.ne.s32.totalorder %s1826_s23, %s1241_s28  ;;  %p1246_p1 = scmp.lt.u32.totalorder %s1826_s23, %s1958_s13 }
 0x196   : > { %p1247_p13 = scmp.lt.u32.totalorder %s1245_s4, %s1241_s28  ;;  %p1249_p4 = scmp.lt.u32.totalorder %s1241_s28, %s1826_s23 }
 0x197   : > { %p1243_p12 = pnand %p1242_p11, %p1954_p10 }
 0x198   : > { %p1248_p0 = por %p1247_p13, %p1246_p1 }
 0x199   : > { %p1244_p2 = pneg %p1243_p12 }
 0x19a   : > { %p1250_p6 = por %p1249_p4, %p1248_p0 }
 0x19c   : > { %p1251_p8 = pnand %p1250_p6, %p1244_p2 }
 0x19e   : > { %1254 = shalt.err (!%p1251_p8)
}
 0x19f   : > { %913 = dma.vmem_to_hbm [thread:$0]  (%p1954_p10), %s1821_s0, 128, %s1826_s23, %s564_s2  }
 0x1a0 PF: > { %s1959_s21 = sld [smem:[#allocation22_spill]]  ;;  %p942_p7 = scmp.ge.s32.totalorder %s1363_s24, 2 }
 0x1a1   : > { %p1960_p5 = scmp.ne.s32.totalorder %s1934_s14, 0 }
 0x1a3   : > { %p929_p9 = pnand %p942_p7, %p1960_p5 }
 0x1a6   : > { %s636_s20 = sand.u32 1, %s1959_s21  }
 0x1a7   : > { %s637_s5 = scalar_lea.sflag [#allocation6], %s636_s20 }
 0x1a8   : > { %1310 = dma.done.wait (!%p929_p9), %s637_s5, 64  }
 0x1a9   : > { %1312 = vsyncadd (!%p929_p9), %s637_s5, 4294967232  ;;  %s1961_s9 = sadd.s32 4294967294, %s1363_s24  }
 0x1aa   : > { %s645_s22 = sand.u32 1, %s1961_s9  }
 0x1ab   : > { %s646_s8 = scalar_lea.sflag [#allocation12], %s645_s22 }
 0x1ac   : > { %1314 = dma.done.wait (!%p929_p9), %s646_s8, 80  }
 0x1ad   : > { %1316 = vsyncadd (!%p929_p9), %s646_s8, 4294967216  ;;  %s663_s30 = scalar_lea.sflag [#allocation15], %s636_s20 }
 0x1ae   : > { %1318 = dma.done.wait (!%p929_p9), %s663_s30, 128  }
 0x1af   : > { %1320 = vsyncadd (!%p929_p9), %s663_s30, 4294967168  ;;  %s38_s24 = sadd.s32 1, %s1363_s24   ;;  %s1962_s14 = sld [smem:[#allocation23_spill]] }
 0x1b0   : > { %p35_p10 = scmp.ge.s32.totalorder %s38_s24, 6   ;;  %s1963_s19 = sld [smem:[#allocation29_spill]] }
 0x1b1   : > { %s1964_s20 = sld [smem:[#allocation24_spill]]  ;;  %s1965_s21 = sld [smem:[#allocation25_spill]] }
 0x1b2   : > { %s1966_s22 = sld [smem:[#allocation26_spill]]  ;;  %s1967_s23 = sld [smem:[#allocation27_spill]] }
 0x1b3   : > { %s1968_s15 = smov %s1327_s16  ;;  %s1969_s16 = smov %s1331_s17 }
 0x1b4   : > { %s1970_s17 = smov %s1537_s27  ;;  %s1971_s0 = smov %s1339_s18 }
 0x1b5   : > { %s1972_s18 = smov %s1962_s14  ;;  %37 = sbr.rel (!%p35_p10) target bundleno = 28 (0x1c), region = 157 }
 0x1bc   :  { %668 = vsyncpa [#allocation5], 1 }
 0x1bd   :  { %670 = vsyncpa [#allocation5 + $0x1], 1 }
 0x1be   :  { %671 = vsyncpa [#allocation8], 1 }
 0x1bf   :  { %673 = vsyncpa [#allocation8 + $0x1], 1 }
 0x1c0   :  { %674 = vsyncpa [#allocation6], 1 }
 0x1c1   :  { %676 = vsyncpa [#allocation6 + $0x1], 1 }
 0x1c2   :  { %677 = vsyncpa [#allocation12], 1 }
 0x1c3   :  { %679 = vsyncpa [#allocation12 + $0x1], 1 }
 0x1c4   :  { %680 = vsyncpa [#allocation15], 1 }
 0x1c5   :  { %682 = vsyncpa [#allocation15 + $0x1], 1 }

</bundles_post_ra>
